<compile_context>
chip_gen: v7x
topology: tpu7x:2x2x1
jax: 0.10.0
libtpu: 0.0.40
codegen_flags: <defaults>
</compile_context>

<pallas_src>
import functools

import jax
import jax.numpy as jnp
from jax.experimental import pallas as pl
from jax.experimental.pallas import tpu as pltpu


def _round_up(x, m):
    return (x + m - 1) // m * m


def _choose_tm(batch):
    """Pick the batch tile size.

    batch <= 128: one tile covering the whole batch (block dims equal the full
    array dims -> always layout-legal, zero padding waste, grid=(1,)).

    batch  > 128: pick TM from {1024, 512, 256, 128} minimizing
        padded_rows + 320 * steps        (320 rows ~ the 0.35 us per-step cost)
    with a penalty on single-step grids so the batch axis can be split across
    the two v7x TensorCores.
    """
    if batch <= 128:
        return batch
    best_tm, best_cost = None, None
    for tm in (1024, 512, 256, 128):
        steps = pl.cdiv(batch, tm)
        padded_rows = steps * tm
        cost = padded_rows + 320 * steps
        if steps == 1:
            cost *= 1.6  # one grid step -> one idle TensorCore on v7x
        if best_cost is None or cost < best_cost:
            best_tm, best_cost = tm, cost
    return best_tm


def actor_kernel(x_ref, w1_ref, b1_ref, w2_ref, b2_ref, w3_ref, b3_ref, o_ref):
    # x arrives f32 at its true feature width; cast to bf16 on the VPU so the
    # MXU runs at native bf16 rate.  All accumulation stays f32.
    x = x_ref[...].astype(jnp.bfloat16)
    # Layer 1: Linear + ReLU
    h1 = jnp.dot(x, w1_ref[...], preferred_element_type=jnp.float32)
    h1 = jnp.maximum(h1 + b1_ref[...], 0.0)
    # Layer 2: Linear + ReLU
    h2 = jnp.dot(h1.astype(jnp.bfloat16), w2_ref[...],
                 preferred_element_type=jnp.float32)
    h2 = jnp.maximum(h2 + b2_ref[...], 0.0)
    # Layer 3: Linear + Sigmoid
    z = jnp.dot(h2.astype(jnp.bfloat16), w3_ref[...],
                preferred_element_type=jnp.float32)
    o_ref[...] = jax.nn.sigmoid(z + b3_ref[...])   # exp on the EUP slot


@functools.partial(jax.jit, static_argnames=("out_dim",))
def actor_forward(x, params, out_dim):
    """x: (B, inp) float32.  params: dict of bf16 weights (in, out) / f32 biases."""
    w1, b1, w2, b2, w3, b3 = (
        params["w1"], params["b1"], params["w2"],
        params["b2"], params["w3"], params["b3"],
    )
    B, inp = x.shape
    H = w1.shape[1]           # padded hidden dim (640)
    Op = w3.shape[1]          # padded output dim

    TM = _choose_tm(B)
    steps = pl.cdiv(B, TM)

    # Weights / biases: constant index_map => DMA'd once and resident in VMEM.
    # Buffered(1): no double-buffering for operands that never change.
    resident = lambda shape: pl.BlockSpec(shape, lambda i: (0, 0),
                                          pipeline_mode=pl.Buffered(1))

    flops = 2 * steps * TM * (inp * H + H * H + H * Op)
    bytes_accessed = (
        B * inp * 4                                   # x (f32, unpadded)
        + (w1.size + w2.size + w3.size) * 2           # weights (bf16), fetched once
        + (b1.size + b2.size + b3.size) * 4           # biases (f32)
        + B * Op * 4                                  # output (f32)
    )

    out = pl.pallas_call(
        actor_kernel,
        out_shape=jax.ShapeDtypeStruct((B, Op), jnp.float32),
        grid=(steps,),
        in_specs=[
            pl.BlockSpec((TM, inp), lambda i: (i, 0)),   # x: tiled over batch
            resident((inp, H)),                          # w1
            resident((1, H)),                            # b1
            resident((H, H)),                            # w2
            resident((1, H)),                            # b2
            resident((H, Op)),                           # w3
            resident((1, Op)),                           # b3
        ],
        out_specs=pl.BlockSpec((TM, Op), lambda i: (i, 0)),
        compiler_params=pltpu.CompilerParams(
            dimension_semantics=("parallel",)),          # megacore batch split
        cost_estimate=pl.CostEstimate(
            flops=flops,
            transcendentals=steps * TM * Op,
            bytes_accessed=bytes_accessed),
    )(x, w1, b1, w2, b2, w3, b3)

    return out[:, :out_dim]


def init_actor_params(key, inp, out, hidden=516):
    """Init mimicking PyTorch nn.Linear default (uniform +-1/sqrt(fan_in)).

    Weights are stored transposed relative to PyTorch, i.e. (in, out), so the
    kernel computes y = x @ W + b on the MXU.  Hidden / output dims are
    zero-padded to lane-aligned sizes (516 -> 640, out -> 128); w1's input dim
    stays at the true `inp` (no input padding needed).  Weights are bf16,
    biases f32.  Zero padding is inert for the Linear+ReLU chain and padded
    output columns are sliced away after the call.
    """
    Hp = _round_up(hidden, 128)
    Op = _round_up(out, 128)

    ks = jax.random.split(key, 6)

    def linear(kw, kb, fan_in, fan_out, rows, cols):
        bound = 1.0 / jnp.sqrt(jnp.float32(fan_in))
        w = jax.random.uniform(kw, (fan_in, fan_out), jnp.float32, -bound, bound)
        b = jax.random.uniform(kb, (fan_out,), jnp.float32, -bound, bound)
        wp = (jnp.zeros((rows, cols), jnp.float32)
              .at[:fan_in, :fan_out].set(w)).astype(jnp.bfloat16)
        bp = jnp.zeros((1, cols), jnp.float32).at[0, :fan_out].set(b)
        return w, b, wp, bp

    w1, b1, w1p, b1p = linear(ks[0], ks[1], inp, hidden, inp, Hp)
    w2, b2, w2p, b2p = linear(ks[2], ks[3], hidden, hidden, Hp, Hp)
    w3, b3, w3p, b3p = linear(ks[4], ks[5], hidden, out, Hp, Op)

    padded = {"w1": w1p, "b1": b1p, "w2": w2p, "b2": b2p, "w3": w3p, "b3": b3p}
    unpadded = {"w1": w1, "b1": b1, "w2": w2, "b2": b2, "w3": w3, "b3": b3}
    return padded, unpadded


def actor_reference_f32(x, up):
    """Pure f32 reference (matches the PyTorch module in full precision)."""
    h1 = jnp.maximum(x @ up["w1"] + up["b1"], 0.0)
    h2 = jnp.maximum(h1 @ up["w2"] + up["b2"], 0.0)
    return jax.nn.sigmoid(h2 @ up["w3"] + up["b3"])


def actor_reference_bf16(x, up):
    """Mixed-precision reference matching the kernel's bf16-weight / f32-accum path."""
    bf = jnp.bfloat16
    dot = lambda a, b: jnp.dot(a, b, preferred_element_type=jnp.float32)
    h1 = jnp.maximum(dot(x.astype(bf), up["w1"].astype(bf)) + up["b1"], 0.0)
    h2 = jnp.maximum(dot(h1.astype(bf), up["w2"].astype(bf)) + up["b2"], 0.0)
    return jax.nn.sigmoid(dot(h2.astype(bf), up["w3"].astype(bf)) + up["b3"])


if __name__ == "__main__":
    key = jax.random.PRNGKey(0)
    k_param, k_x1, k_x2 = jax.random.split(key, 3)

    batch, inp, out = 2, 16, 4  # small shapes consistent with Actor(inp, out)
    padded_params, unpadded_params = init_actor_params(k_param, inp, out)

    # --- small-batch path (single tile, grid=(1,)) -------------------------
    x = jax.random.normal(k_x1, (batch, inp), jnp.float32)
    y = jax.block_until_ready(actor_forward(x, padded_params, out))
    assert y.shape == (batch, out), y.shape

    y_bf16_ref = actor_reference_bf16(x, unpadded_params)
    assert jnp.allclose(y, y_bf16_ref, atol=1e-3, rtol=1e-3), (y, y_bf16_ref)
    y_f32_ref = actor_reference_f32(x, unpadded_params)
    assert jnp.allclose(y, y_f32_ref, atol=2e-2, rtol=2e-2), (y, y_f32_ref)

    # --- multi-tile path (ragged last tile, parallel grid) -----------------
    big_batch = 384
    xb = jax.random.normal(k_x2, (big_batch, inp), jnp.float32)
    yb = jax.block_until_ready(actor_forward(xb, padded_params, out))
    assert yb.shape == (big_batch, out), yb.shape
    yb_ref = actor_reference_bf16(xb, unpadded_params)
    assert jnp.allclose(yb, yb_ref, atol=1e-3, rtol=1e-3)

    print("KERNEL_OK")
</pallas_src>

<mosaic_0001>
module attributes {stable_mosaic.version = 11 : i64} {
  func.func @actor_kernel(%arg0: i32, %arg1: memref<2x16xf32, #tpu.memory_space<vmem>>, %arg2: memref<16x640xbf16, #tpu.memory_space<vmem>>, %arg3: memref<1x640xf32, #tpu.memory_space<vmem>>, %arg4: memref<640x640xbf16, #tpu.memory_space<vmem>>, %arg5: memref<1x640xf32, #tpu.memory_space<vmem>>, %arg6: memref<640x128xbf16, #tpu.memory_space<vmem>>, %arg7: memref<1x128xf32, #tpu.memory_space<vmem>>, %arg8: memref<2x128xf32, #tpu.memory_space<vmem>>) attributes {dimension_semantics = [#tpu.dimension_semantics<parallel>], iteration_bounds = array<i64: 1>, scalar_prefetch = 0 : i64, scratch_operands = 0 : i64, tpu.core_type = #tpu.core_type<tc>, window_params = [{transform_indices = @transform_0, window_bounds = array<i64: 2, 16>}, {pipeline_mode = #tpu.pipeline_mode<synchronous>, transform_indices = @transform_1, window_bounds = array<i64: 16, 640>}, {pipeline_mode = #tpu.pipeline_mode<synchronous>, transform_indices = @transform_2, window_bounds = array<i64: 1, 640>}, {pipeline_mode = #tpu.pipeline_mode<synchronous>, transform_indices = @transform_3, window_bounds = array<i64: 640, 640>}, {pipeline_mode = #tpu.pipeline_mode<synchronous>, transform_indices = @transform_4, window_bounds = array<i64: 1, 640>}, {pipeline_mode = #tpu.pipeline_mode<synchronous>, transform_indices = @transform_5, window_bounds = array<i64: 640, 128>}, {pipeline_mode = #tpu.pipeline_mode<synchronous>, transform_indices = @transform_6, window_bounds = array<i64: 1, 128>}, {transform_indices = @transform_7, window_bounds = array<i64: 2, 128>}]} {
    %c0 = arith.constant 0 : index
    %c0_0 = arith.constant 0 : index
    %0 = vector.load %arg1[%c0, %c0_0] : memref<2x16xf32, #tpu.memory_space<vmem>>, vector<2x16xf32>
    %1 = arith.truncf %0 : vector<2x16xf32> to vector<2x16xbf16>
    %c0_1 = arith.constant 0 : index
    %c0_2 = arith.constant 0 : index
    %2 = vector.load %arg2[%c0_1, %c0_2] : memref<16x640xbf16, #tpu.memory_space<vmem>>, vector<16x640xbf16>
    %cst = arith.constant dense<0.000000e+00> : vector<2x640xf32>
    %3 = tpu.matmul %1, %2, %cst {dimension_numbers = #tpu.dot_dimension_numbers<[1], [0], [0], [1], [0, 0, 1, 1], [], []>} : vector<2x16xbf16>, vector<16x640xbf16>, vector<2x640xf32> -> vector<2x640xf32>
    %c0_3 = arith.constant 0 : index
    %c0_4 = arith.constant 0 : index
    %4 = vector.load %arg3[%c0_3, %c0_4] : memref<1x640xf32, #tpu.memory_space<vmem>>, vector<1x640xf32>
    %5 = vector.broadcast %4 : vector<1x640xf32> to vector<2x640xf32>
    %6 = arith.addf %3, %5 : vector<2x640xf32>
    %cst_5 = arith.constant 0.000000e+00 : f32
    %7 = vector.broadcast %cst_5 : f32 to vector<2x640xf32>
    %8 = arith.maximumf %6, %7 : vector<2x640xf32>
    %9 = arith.truncf %8 : vector<2x640xf32> to vector<2x640xbf16>
    %c0_6 = arith.constant 0 : index
    %c0_7 = arith.constant 0 : index
    %10 = vector.load %arg4[%c0_6, %c0_7] : memref<640x640xbf16, #tpu.memory_space<vmem>>, vector<640x640xbf16>
    %cst_8 = arith.constant dense<0.000000e+00> : vector<2x640xf32>
    %11 = tpu.matmul %9, %10, %cst_8 {dimension_numbers = #tpu.dot_dimension_numbers<[1], [0], [0], [1], [0, 0, 1, 1], [], []>} : vector<2x640xbf16>, vector<640x640xbf16>, vector<2x640xf32> -> vector<2x640xf32>
    %c0_9 = arith.constant 0 : index
    %c0_10 = arith.constant 0 : index
    %12 = vector.load %arg5[%c0_9, %c0_10] : memref<1x640xf32, #tpu.memory_space<vmem>>, vector<1x640xf32>
    %13 = vector.broadcast %12 : vector<1x640xf32> to vector<2x640xf32>
    %14 = arith.addf %11, %13 : vector<2x640xf32>
    %cst_11 = arith.constant 0.000000e+00 : f32
    %15 = vector.broadcast %cst_11 : f32 to vector<2x640xf32>
    %16 = arith.maximumf %14, %15 : vector<2x640xf32>
    %17 = arith.truncf %16 : vector<2x640xf32> to vector<2x640xbf16>
    %c0_12 = arith.constant 0 : index
    %c0_13 = arith.constant 0 : index
    %18 = vector.load %arg6[%c0_12, %c0_13] : memref<640x128xbf16, #tpu.memory_space<vmem>>, vector<640x128xbf16>
    %cst_14 = arith.constant dense<0.000000e+00> : vector<2x128xf32>
    %19 = tpu.matmul %17, %18, %cst_14 {dimension_numbers = #tpu.dot_dimension_numbers<[1], [0], [0], [1], [0, 0, 1, 1], [], []>} : vector<2x640xbf16>, vector<640x128xbf16>, vector<2x128xf32> -> vector<2x128xf32>
    %c0_15 = arith.constant 0 : index
    %c0_16 = arith.constant 0 : index
    %20 = vector.load %arg7[%c0_15, %c0_16] : memref<1x128xf32, #tpu.memory_space<vmem>>, vector<1x128xf32>
    %21 = vector.broadcast %20 : vector<1x128xf32> to vector<2x128xf32>
    %22 = arith.addf %19, %21 : vector<2x128xf32>
    %23 = arith.negf %22 : vector<2x128xf32>
    %24 = math.exp %23 : vector<2x128xf32>
    %cst_17 = arith.constant 1.000000e+00 : f32
    %25 = vector.broadcast %cst_17 : f32 to vector<2x128xf32>
    %26 = arith.addf %25, %24 : vector<2x128xf32>
    %27 = arith.divf %25, %26 : vector<2x128xf32>
    %c0_18 = arith.constant 0 : index
    %c0_19 = arith.constant 0 : index
    %28 = vector.load %arg8[%c0_18, %c0_19] : memref<2x128xf32, #tpu.memory_space<vmem>>, vector<2x128xf32>
    tpu.vector_store %arg8[%c0_18, %c0_19], %27 {strides = array<i32>} : memref<2x128xf32, #tpu.memory_space<vmem>>, vector<2x128xf32>,
    return
  }
  func.func @transform_0(%arg0: i32) -> (i32, i32) {
    %c0_i32 = arith.constant 0 : i32
    %c0_i32_0 = arith.constant 0 : i32
    return %arg0, %c0_i32 : i32, i32
  }
  func.func @transform_1(%arg0: i32) -> (i32, i32) {
    %c0_i32 = arith.constant 0 : i32
    %c0_i32_0 = arith.constant 0 : i32
    %c0_i32_1 = arith.constant 0 : i32
    return %c0_i32, %c0_i32_0 : i32, i32
  }
  func.func @transform_2(%arg0: i32) -> (i32, i32) {
    %c0_i32 = arith.constant 0 : i32
    %c0_i32_0 = arith.constant 0 : i32
    %c0_i32_1 = arith.constant 0 : i32
    return %c0_i32, %c0_i32_0 : i32, i32
  }
  func.func @transform_3(%arg0: i32) -> (i32, i32) {
    %c0_i32 = arith.constant 0 : i32
    %c0_i32_0 = arith.constant 0 : i32
    %c0_i32_1 = arith.constant 0 : i32
    return %c0_i32, %c0_i32_0 : i32, i32
  }
  func.func @transform_4(%arg0: i32) -> (i32, i32) {
    %c0_i32 = arith.constant 0 : i32
    %c0_i32_0 = arith.constant 0 : i32
    %c0_i32_1 = arith.constant 0 : i32
    return %c0_i32, %c0_i32_0 : i32, i32
  }
  func.func @transform_5(%arg0: i32) -> (i32, i32) {
    %c0_i32 = arith.constant 0 : i32
    %c0_i32_0 = arith.constant 0 : i32
    %c0_i32_1 = arith.constant 0 : i32
    return %c0_i32, %c0_i32_0 : i32, i32
  }
  func.func @transform_6(%arg0: i32) -> (i32, i32) {
    %c0_i32 = arith.constant 0 : i32
    %c0_i32_0 = arith.constant 0 : i32
    %c0_i32_1 = arith.constant 0 : i32
    return %c0_i32, %c0_i32_0 : i32, i32
  }
  func.func @transform_7(%arg0: i32) -> (i32, i32) {
    %c0_i32 = arith.constant 0 : i32
    %c0_i32_0 = arith.constant 0 : i32
    return %arg0, %c0_i32 : i32, i32
  }
}

</mosaic_0001>

<bundles_post_ra>
// kernel: actor_forward.1
= control target key start
LH: loop header
LB: loop body
LE: loop exit
PB: predicated region body
PF: predicated region fallthrough
CT: control target
= control target key end

     0   :  { %12 = vsyncpa [#allocation3], 0  ;;  %s3577_s0 = inlined_call_operand.hbm [shape: f32[2,16], index: 0, kind: input, shape index: {}]   ;;  %s3578_s1 = inlined_call_operand.hbm [shape: bf16[16,640], index: 1, kind: input, shape index: {}]   ;;  %s3579_s2 = inlined_call_operand.hbm [shape: f32[1,640], index: 2, kind: input, shape index: {}]   ;;  %s3580_s3 = inlined_call_operand.hbm [shape: bf16[640,640], index: 3, kind: input, shape index: {}]   ;;  %s3581_s4 = inlined_call_operand.vmem [shape: f32[1,640], index: 4, kind: input, shape index: {}]   ;;  %s3582_s5 = inlined_call_operand.hbm [shape: bf16[640,128], index: 5, kind: input, shape index: {}]   ;;  %s3583_s6 = inlined_call_operand.vmem [shape: f32[1,128], index: 6, kind: input, shape index: {}]   ;;  %s3584_s7 = inlined_call_operand.hbm [shape: f32[2,128], index: 7, kind: output, shape index: {}]  }
   0x1   :  { %13 = vsyncpa [#allocation6], 0 }
   0x2   :  { %14 = vsyncpa [#allocation9], 0 }
   0x3   :  { %15 = vsyncpa [#allocation4], 0  ;;  %s3351_s24 = smov [#allocation5]   ;;  %s3211_s28 = scalar_lea.hbm %s3578_s1, 640 }
   0x4   :  { %s31_s25 = sshll.u32 %s3351_s24, 4  ;;  %p3212_p0 = scmp.ne.s32.totalorder %s3578_s1, %s3211_s28  ;;  %s32_s25 = int_to_ptr.vmem [resolvable:$true] %s31_s25 }
   0x5   :  { %p3215_p1 = scmp.lt.u32.totalorder %s3211_s28, %s3578_s1 }
   0x7   :  { %p3217_p2 = pnand %p3215_p1, %p3212_p0 }
   0x9   :  { %3220 = shalt.err (!%p3217_p2)
}
   0xa   :  { %s3221_s10 = scalar_lea.vmem %s32_s25, 640  ;;  %p3226_p4 = scmp.lt.s32.totalorder %s32_s25, %s32_s25 }
   0xb   :  { %p3222_p3 = scmp.ne.s32.totalorder %s32_s25, %s3221_s10  ;;  %p3227_p5 = scmp.lt.s32.totalorder %s3221_s10, %s3221_s10 }
   0xd   :  { %p3228_p6 = por %p3227_p5, %p3226_p4 }
   0xf   :  { %p3229_p7 = pnand %p3228_p6, %p3222_p3 }
  0x11   :  { %3232 = shalt.err (!%p3229_p7)
}
  0x12   :  { %s3352_s11 = smov 320   ;;  %s3353_s12 = smov 20  }
  0x13   :  { %37 = dma.hbm_to_vmem [thread:$0]  %s3578_s1, 640, %s32_s25, [#allocation6], %s3352_s11, %s3352_s11, %s3353_s12  }
  0x14   :  { %s3354_s15 = smov [#allocation8]   ;;  %s3355_s17 = smov [#allocation2]  }
  0x15   :  { %s53_s16 = sshll.u32 %s3354_s15, 4  ;;  %s22_s18 = sshll.u32 %s3355_s17, 4  ;;  %s54_s16 = int_to_ptr.vmem [resolvable:$true] %s53_s16  ;;  %s23_s18 = int_to_ptr.vmem [resolvable:$true] %s22_s18 }
  0x16   :  { %s3233_s21 = scalar_lea.hbm %s3580_s3, 25600 }
  0x17   :  { %p3234_p8 = scmp.ne.s32.totalorder %s3580_s3, %s3233_s21  ;;  %p3237_p9 = scmp.lt.u32.totalorder %s3233_s21, %s3580_s3 }
  0x19   :  { %p3239_p10 = pnand %p3237_p9, %p3234_p8 }
  0x1b   :  { %3242 = shalt.err (!%p3239_p10)
}
  0x1c   :  { %s3243_s1 = scalar_lea.vmem %s54_s16, 25600  ;;  %p3248_p12 = scmp.lt.s32.totalorder %s54_s16, %s54_s16 }
  0x1d   :  { %p3244_p11 = scmp.ne.s32.totalorder %s54_s16, %s3243_s1  ;;  %p3249_p13 = scmp.lt.s32.totalorder %s3243_s1, %s3243_s1 }
  0x1f   :  { %p3250_p0 = por %p3249_p13, %p3248_p12 }
  0x21   :  { %p3251_p1 = pnand %p3250_p0, %p3244_p11 }
  0x23   :  { %3254 = shalt.err (!%p3251_p1)
}
  0x24   :  { %59 = dma.hbm_to_vmem [thread:$0]  %s3580_s3, 25600, %s54_s16, [#allocation9], %s3352_s11, %s3352_s11, %s3353_s12  }
  0x25   :  { %s3255_s30 = scalar_lea.hbm %s3577_s0, 32 }
  0x26   :  { %p3256_p2 = scmp.ne.s32.totalorder %s3577_s0, %s3255_s30  ;;  %p3259_p3 = scmp.lt.u32.totalorder %s3255_s30, %s3577_s0 }
  0x28   :  { %p3261_p4 = pnand %p3259_p3, %p3256_p2 }
  0x2a   :  { %3264 = shalt.err (!%p3261_p4)
}
  0x2b   :  { %s3265_s14 = scalar_lea.vmem %s23_s18, 32  ;;  %p3270_p6 = scmp.lt.s32.totalorder %s23_s18, %s23_s18 }
  0x2c   :  { %p3266_p5 = scmp.ne.s32.totalorder %s23_s18, %s3265_s14  ;;  %p3271_p7 = scmp.lt.s32.totalorder %s3265_s14, %s3265_s14 }
  0x2e   :  { %p3272_p8 = por %p3271_p7, %p3270_p6 }
  0x30   :  { %p3273_p9 = pnand %p3272_p8, %p3266_p5 }
  0x32   :  { %3276 = shalt.err (!%p3273_p9)
}
  0x33   :  { %25 = dma.hbm_to_vmem [thread:$0]  %s3577_s0, 32, %s23_s18, [#allocation3]  }
  0x34   :  { %s3356_s12 = smov [#allocation7]   ;;  %s3357_s16 = smov [#allocation10]  }
  0x35   :  { %s44_s15 = sshll.u32 %s3356_s12, 4  ;;  %s67_s17 = sshll.u32 %s3357_s16, 4  ;;  %s45_s15 = int_to_ptr.vmem [resolvable:$true] %s44_s15  ;;  %s68_s17 = int_to_ptr.vmem [resolvable:$true] %s67_s17 }
  0x36   :  { %s3277_s21 = scalar_lea.hbm %s3579_s2, 80 }
  0x37   :  { %p3278_p10 = scmp.ne.s32.totalorder %s3579_s2, %s3277_s21  ;;  %p3281_p11 = scmp.lt.u32.totalorder %s3277_s21, %s3579_s2 }
  0x39   :  { %p3283_p12 = pnand %p3281_p11, %p3278_p10 }
  0x3b   :  { %3286 = shalt.err (!%p3283_p12)
}
  0x3c   :  { %s3287_s0 = scalar_lea.vmem %s45_s15, 80  ;;  %s3291_s18 = scalar_lea.vmem %s45_s15, 96 }
  0x3d   :  { %p3288_p13 = scmp.ne.s32.totalorder %s45_s15, %s3287_s0  ;;  %p3292_p0 = scmp.lt.s32.totalorder %s45_s15, %s45_s15 }
  0x3e   :  { %p3293_p1 = scmp.lt.s32.totalorder %s3291_s18, %s3287_s0 }
  0x40   :  { %p3294_p2 = por %p3293_p1, %p3292_p0 }
  0x42   :  { %p3295_p3 = pnand %p3294_p2, %p3288_p13 }
  0x44   :  { %3298 = shalt.err (!%p3295_p3)
}
  0x45   :  { %47 = dma.hbm_to_vmem [thread:$0]  %s3579_s2, 80, %s45_s15, [#allocation6]  }
  0x46   :  { %s3299_s29 = scalar_lea.hbm %s3582_s5, 5120 }
  0x47   :  { %p3300_p4 = scmp.ne.s32.totalorder %s3582_s5, %s3299_s29  ;;  %p3303_p5 = scmp.lt.u32.totalorder %s3299_s29, %s3582_s5 }
  0x49   :  { %p3305_p6 = pnand %p3303_p5, %p3300_p4 }
  0x4b   :  { %3308 = shalt.err (!%p3305_p6)
}
  0x4c   :  { %s3309_s13 = scalar_lea.vmem %s68_s17, 5120  ;;  %p3314_p8 = scmp.lt.s32.totalorder %s68_s17, %s68_s17 }
  0x4d   :  { %p3310_p7 = scmp.ne.s32.totalorder %s68_s17, %s3309_s13  ;;  %p3315_p9 = scmp.lt.s32.totalorder %s3309_s13, %s3309_s13 }
  0x4f   :  { %p3316_p10 = por %p3315_p9, %p3314_p8 }
  0x51   :  { %p3317_p11 = pnand %p3316_p10, %p3310_p7 }
  0x53   :  { %3320 = shalt.err (!%p3317_p11)
}
  0x54   :  { %s3358_s2 = smov 64   ;;  %s3359_s14 = smov 4  }
  0x55   :  { %73 = dma.hbm_to_vmem [thread:$0]  %s3582_s5, 5120, %s68_s17, [#allocation9], %s3358_s2, %s3358_s2, %s3359_s14  }
  0x56   :  { %3343 = dma.done.wait [#allocation3], 32  }
  0x57   :  { %3344 = vsyncadd [#allocation3], 4294967264 }
  0x58   :  { %3345 = dma.done.wait [#allocation6], 720  }
  0x59   :  { %3346 = vsyncadd [#allocation6], 4294966576 }
  0x5a   :  { %3347 = dma.done.wait [#allocation9], 30720  }
  0x5b   :  { %3348 = vsyncadd [#allocation9], 4294936576  ;;  %v3360_v0 = vmov 0   ;;  %v2880_v1 = vld [vmem:[#allocation5 + $0x4] ss:$20 sps:$4 sm:$0xff]   ;;  %vm153_vm0 = vcmask 130048  }
  0x5c   :  { %189 = vmatprep.mubr.bf16.mxu0 %v3360_v0  ;;  %230 = vmatprep.mubr.bf16.mxu1 %v3360_v0  ;;  %v2882_v2 = vld [vmem:[#allocation5] ss:$20 sps:$4 sm:$0xff]   ;;  %v92_v3 = vld [vmem:[#allocation2] sm:$0x3]  ;;  %v2886_v7 = vld [vmem:[#allocation5 + $0x10] ss:$20 sps:$4 sm:$0xff]  }
  0x5d   :  { %157 = vmatprep.subr.bf16.mxu0 %v2880_v1  ;;  %v93_v4 = vpack.c.bf16 %v92_v3, %v92_v3  ;;  %v2883_v5 = vld [vmem:[#allocation5 + $0xc] ss:$20 sps:$4 sm:$0xff]   ;;  %v2885_v6 = vld [vmem:[#allocation5 + $0x8] ss:$20 sps:$4 sm:$0xff]   ;;  %v3361_v8 = vmov 0.0   ;;  %vm3362_vm1 = vmmov 0  }
  0x5e   :  { %158 = vmatpush1.bf16.msra.mxu0 %v2882_v2  ;;  %198 = vmatprep.subr.bf16.mxu1 %v2883_v5  ;;  %v2887_v9 = vld [vmem:[#allocation8] ss:$20 sps:$4 sm:$0xff]   ;;  %v2889_v10 = vld [vmem:[#allocation8 + $0x4] ss:$20 sps:$4 sm:$0xff]   ;;  %v2893_v13 = vld [vmem:[#allocation8 + $0x28] ss:$20 sps:$4 sm:$0xff]  }
  0x5f   :  { %2801 = vmatprep.subr.bf16.mxu0 %v3361_v8  ;;  %199 = vmatpush1.bf16.msra.mxu1 %v2885_v6  ;;  %v2892_v11 = vld [vmem:[#allocation8 + $0xc] ss:$20 sps:$4 sm:$0xff]   ;;  %v2901_v14 = vld [vmem:[#allocation8 + $0x54] ss:$20 sps:$4 sm:$0xff]   ;;  %v2899_v17 = vld [vmem:[#allocation8 + $0x50] ss:$20 sps:$4 sm:$0xff]  }
  0x60   :  { %v2895_v12 = vld [vmem:[#allocation8 + $0x2c] ss:$20 sps:$4 sm:$0xff]   ;;  %1596 = vmatprep.subr.bf16.mxu1 %v2889_v10  ;;  %v2890_v15 = vld [vmem:[#allocation8 + $0x8] ss:$20 sps:$4 sm:$0xff]   ;;  %v2896_v19 = vld [vmem:[#allocation8 + $0x30] ss:$20 sps:$4 sm:$0xff]  }
  0x61   :  { %2448 = vmatmul.mubr.msk.bf16.vlgmr.msra.gmra.mrb[0].mxu0 %vm153_vm0, %v93_v4  ;;  %v2898_v16 = vld [vmem:[#allocation8 + $0x34] ss:$20 sps:$4 sm:$0xff]   ;;  %v2907_v18 = vld [vmem:[#allocation8 + $0x7c] ss:$20 sps:$4 sm:$0xff]   ;;  %v2905_v21 = vld [vmem:[#allocation8 + $0x78] ss:$20 sps:$4 sm:$0xff]  }
  0x62   :  { %2802 = vmatpush3.bf16.msra.mxu0 %v2886_v7  ;;  %2803 = vmatprep.mubr.msk.bf16.mxu0 %vm3362_vm1, %v3361_v8  ;;  %v2904_v20 = vld [vmem:[#allocation8 + $0x5c] ss:$20 sps:$4 sm:$0xff]   ;;  %v2913_v22 = vld [vmem:[#allocation8 + $0xa4] ss:$20 sps:$4 sm:$0xff]   ;;  %v2911_v25 = vld [vmem:[#allocation8 + $0xa0] ss:$20 sps:$4 sm:$0xff]  }
  0x63   :  { %2449 = vmatmul.mubr.msk.bf16.vlgmr.msra.gmra.mrb[0].mxu1 %vm153_vm0, %v93_v4  ;;  %1719 = vmatprep.subr.bf16.mxu0 %v2892_v11  ;;  %v2902_v23 = vld [vmem:[#allocation8 + $0x58] ss:$20 sps:$4 sm:$0xff]   ;;  %v2908_v27 = vld [vmem:[#allocation8 + $0x80] ss:$20 sps:$4 sm:$0xff]   ;;  %v2917_v29 = vld [vmem:[#allocation8 + $0xc8] ss:$20 sps:$4 sm:$0xff]  }
  0x64   :  { %1597 = vmatpush1.bf16.msra.mxu1 %v2887_v9  ;;  %v2910_v24 = vld [vmem:[#allocation8 + $0x84] ss:$20 sps:$4 sm:$0xff]   ;;  %v2919_v26 = vld [vmem:[#allocation8 + $0xcc] ss:$20 sps:$4 sm:$0xff]   ;;  %v2925_v30 = vld [vmem:[#allocation8 + $0xf4] ss:$20 sps:$4 sm:$0xff]  }
  0x65   :  { %1598 = vmatprep.subr.bf16.mxu1 %v2895_v12  ;;  %v2916_v28 = vld [vmem:[#allocation8 + $0xac] ss:$20 sps:$4 sm:$0xff]   ;;  %v2914_v31 = vld [vmem:[#allocation8 + $0xa8] ss:$20 sps:$4 sm:$0xff]   ;;  %v2923_v33 = vld [vmem:[#allocation8 + $0xf0] ss:$20 sps:$4 sm:$0xff]  }
  0x66   :  { %v2922_v32 = vld [vmem:[#allocation8 + $0xd4] ss:$20 sps:$4 sm:$0xff]   ;;  %v2931_v34 = vld [vmem:[#allocation8 + $0x11c] ss:$20 sps:$4 sm:$0xff]   ;;  %v2929_v37 = vld [vmem:[#allocation8 + $0x118] ss:$20 sps:$4 sm:$0xff]  }
  0x67   :  { %v2920_v35 = vld [vmem:[#allocation8 + $0xd0] ss:$20 sps:$4 sm:$0xff]   ;;  %v2926_v39 = vld [vmem:[#allocation8 + $0xf8] ss:$20 sps:$4 sm:$0xff]   ;;  %v2935_v41 = vld [vmem:[#allocation8 + $0x140] ss:$20 sps:$4 sm:$0xff]  }
  0x68   :  { %1599 = vmatpush1.bf16.msra.mxu1 %v2893_v13  ;;  %v2928_v36 = vld [vmem:[#allocation8 + $0xfc] ss:$20 sps:$4 sm:$0xff]   ;;  %v2937_v38 = vld [vmem:[#allocation8 + $0x144] ss:$20 sps:$4 sm:$0xff]   ;;  %v2943_v42 = vld [vmem:[#allocation8 + $0x16c] ss:$20 sps:$4 sm:$0xff]   ;;  %v102_v13 = vlaneseq }
  0x69   :  { %2804 = vmatmul.mubr.msk.bf16.vlgmr.msra.gmra.mrb[4].mxu0 %vm153_vm0, %v93_v4  ;;  %1600 = vmatprep.subr.bf16.mxu1 %v2901_v14  ;;  %v2934_v40 = vld [vmem:[#allocation8 + $0x124] ss:$20 sps:$4 sm:$0xff]   ;;  %v2932_v43 = vld [vmem:[#allocation8 + $0x120] ss:$20 sps:$4 sm:$0xff]   ;;  %v2938_v45 = vld [vmem:[#allocation8 + $0x148] ss:$20 sps:$4 sm:$0xff]  }
  0x6a   :  { %1720 = vmatpush1.bf16.msra.mxu0 %v2890_v15  ;;  %v2940_v44 = vld [vmem:[#allocation8 + $0x14c] ss:$20 sps:$4 sm:$0xff]   ;;  %v2941_v46 = vld [vmem:[#allocation8 + $0x168] ss:$20 sps:$4 sm:$0xff]   ;;  %v2947_v49 = vld [vmem:[#allocation8 + $0x190] ss:$20 sps:$4 sm:$0xff]  }
  0x6b   :  { %1721 = vmatprep.subr.bf16.mxu0 %v2898_v16  ;;  %v2949_v47 = vld [vmem:[#allocation8 + $0x194] ss:$20 sps:$4 sm:$0xff]   ;;  %v2955_v50 = vld [vmem:[#allocation8 + $0x1bc] ss:$20 sps:$4 sm:$0xff]   ;;  %v2953_v53 = vld [vmem:[#allocation8 + $0x1b8] ss:$20 sps:$4 sm:$0xff]  }
  0x6c   :  { %1601 = vmatpush1.bf16.msra.mxu1 %v2899_v17  ;;  %v2946_v48 = vld [vmem:[#allocation8 + $0x174] ss:$20 sps:$4 sm:$0xff]   ;;  %v2944_v51 = vld [vmem:[#allocation8 + $0x170] ss:$20 sps:$4 sm:$0xff]   ;;  %v2950_v55 = vld [vmem:[#allocation8 + $0x198] ss:$20 sps:$4 sm:$0xff]  }
  0x6d   :  { %1602 = vmatprep.subr.bf16.mxu1 %v2907_v18  ;;  %v2952_v52 = vld [vmem:[#allocation8 + $0x19c] ss:$20 sps:$4 sm:$0xff]   ;;  %v2961_v54 = vld [vmem:[#allocation8 + $0x1e4] ss:$20 sps:$4 sm:$0xff]   ;;  %v2959_v57 = vld [vmem:[#allocation8 + $0x1e0] ss:$20 sps:$4 sm:$0xff]  }
  0x6e   :  { %1722 = vmatpush1.bf16.msra.mxu0 %v2896_v19  ;;  %v2958_v56 = vld [vmem:[#allocation8 + $0x1c4] ss:$20 sps:$4 sm:$0xff]   ;;  %v2967_v58 = vld [vmem:[#allocation8 + $0x20c] ss:$20 sps:$4 sm:$0xff]   ;;  %v2965_v61 = vld [vmem:[#allocation8 + $0x208] ss:$20 sps:$4 sm:$0xff]  }
  0x6f   :  { %1723 = vmatprep.subr.bf16.mxu0 %v2904_v20  ;;  %v2956_v59 = vld [vmem:[#allocation8 + $0x1c0] ss:$20 sps:$4 sm:$0xff]   ;;  %v2962_v62 = vld [vmem:[#allocation8 + $0x1e8] ss:$20 sps:$4 sm:$0xff]   ;;  %v2968_v1 = vld [vmem:[#allocation8 + $0x210] ss:$20 sps:$4 sm:$0xff]  }
  0x70   :  { %1603 = vmatpush1.bf16.msra.mxu1 %v2905_v21  ;;  %v2964_v60 = vld [vmem:[#allocation8 + $0x1ec] ss:$20 sps:$4 sm:$0xff]   ;;  %v2970_v63 = vld [vmem:[#allocation8 + $0x214] ss:$20 sps:$4 sm:$0xff]   ;;  %v2976_v3 = vld [vmem:[#allocation8 + $0x23c] ss:$20 sps:$4 sm:$0xff]  }
  0x71   :  { %1604 = vmatprep.subr.bf16.mxu1 %v2913_v22  ;;  %v2973_v2 = vld [vmem:[#allocation8 + $0x234] ss:$20 sps:$4 sm:$0xff]   ;;  %v2971_v4 = vld [vmem:[#allocation8 + $0x230] ss:$20 sps:$4 sm:$0xff]   ;;  %v2974_v5 = vld [vmem:[#allocation8 + $0x238] ss:$20 sps:$4 sm:$0xff]  }
  0x72   :  { %1724 = vmatpush1.bf16.msra.mxu0 %v2902_v23  ;;  %v2979_v6 = vld [vmem:[#allocation8 + $0x25c] ss:$20 sps:$4 sm:$0xff]   ;;  %v2982_v7 = vld [vmem:[#allocation8 + $0x264] ss:$20 sps:$4 sm:$0xff]   ;;  %v2980_v10 = vld [vmem:[#allocation8 + $0x260] ss:$20 sps:$4 sm:$0xff]  }
  0x73   :  { %1725 = vmatprep.subr.bf16.mxu0 %v2910_v24  ;;  %v2977_v9 = vld [vmem:[#allocation8 + $0x258] ss:$20 sps:$4 sm:$0xff]   ;;  %v3472_v14 = vshrl.u32 %v102_v13, 7  ;;  %v3031_v13 = vld [vmem:[#allocation8 + $0x3c0] ss:$20 sps:$4 sm:$0xff]  }
  0x74   :  { %1605 = vmatpush1.bf16.msra.mxu1 %v2911_v25  ;;  %v2985_v11 = vld [vmem:[#allocation8 + $0x284] ss:$20 sps:$4 sm:$0xff]   ;;  %v2988_v12 = vld [vmem:[#allocation8 + $0x28c] ss:$20 sps:$4 sm:$0xff]  }
  0x75   :  { %1606 = vmatprep.subr.bf16.mxu1 %v2919_v26  ;;  %v104_v15 = vsub.s32 0, %v3472_v14  ;;  %v3475_v16 = vld [vmem:[#allocation7] sm:$0x1f]  ;;  %v108_v17 = vsub.s32 1, %v3472_v14  ;;  %v116_v18 = vsub.s32 3, %v3472_v14 }
  0x76   :  { %1726 = vmatpush1.bf16.msra.mxu0 %v2908_v27 }
  0x77   :  { %1727 = vmatprep.subr.bf16.mxu0 %v2916_v28  ;;  %v105_v19 = vrot.slane %v3475_v16, %v104_v15  ;;  %v109_v20 = vrot.slane %v3475_v16, %v108_v17  ;;  %v117_v22 = vrot.slane %v3475_v16, %v116_v18 }
  0x78   :  { %1607 = vmatpush1.bf16.msra.mxu1 %v2917_v29 }
  0x79   :  { %1608 = vmatprep.subr.bf16.mxu1 %v2925_v30 }
  0x7a   :  { %1728 = vmatpush1.bf16.msra.mxu0 %v2914_v31 }
  0x7b   :  { %1729 = vmatprep.subr.bf16.mxu0 %v2922_v32 }
  0x7c   :  { %1609 = vmatpush1.bf16.msra.mxu1 %v2923_v33 }
  0x7d   :  { %1610 = vmatprep.subr.bf16.mxu1 %v2931_v34 }
  0x7e   :  { %1730 = vmatpush1.bf16.msra.mxu0 %v2920_v35 }
  0x7f   :  { %1731 = vmatprep.subr.bf16.mxu0 %v2928_v36  ;;  %v2983_v36 = vld [vmem:[#allocation8 + $0x280] ss:$20 sps:$4 sm:$0xff]  }
  0x80   :  { %1611 = vmatpush1.bf16.msra.mxu1 %v2929_v37  ;;  %v2986_v37 = vld [vmem:[#allocation8 + $0x288] ss:$20 sps:$4 sm:$0xff]  }
  0x81   :  { %1612 = vmatprep.subr.bf16.mxu1 %v2937_v38 }
  0x82   :  { %1732 = vmatpush1.bf16.msra.mxu0 %v2926_v39 }
  0x83   :  { %1733 = vmatprep.subr.bf16.mxu0 %v2934_v40  ;;  %v2991_v40 = vld [vmem:[#allocation8 + $0x2ac] ss:$20 sps:$4 sm:$0xff]  }
  0x84   :  { %1613 = vmatpush1.bf16.msra.mxu1 %v2935_v41  ;;  %v2994_v41 = vld [vmem:[#allocation8 + $0x2b4] ss:$20 sps:$4 sm:$0xff]  }
  0x85   :  { %1614 = vmatprep.subr.bf16.mxu1 %v2943_v42 }
  0x86   :  { %1734 = vmatpush1.bf16.msra.mxu0 %v2932_v43 }
  0x87   :  { %1735 = vmatprep.subr.bf16.mxu0 %v2940_v44 }
  0x88   :  { %1615 = vmatpush1.bf16.msra.mxu1 %v2941_v46  ;;  %v2992_v46 = vld [vmem:[#allocation8 + $0x2b0] ss:$20 sps:$4 sm:$0xff]  }
  0x89   :  { %1616 = vmatprep.subr.bf16.mxu1 %v2949_v47 }
  0x8a   :  { %1736 = vmatpush1.bf16.msra.mxu0 %v2938_v45  ;;  %v2989_v45 = vld [vmem:[#allocation8 + $0x2a8] ss:$20 sps:$4 sm:$0xff]  }
  0x8b   :  { %1737 = vmatprep.subr.bf16.mxu0 %v2946_v48  ;;  %v2997_v48 = vld [vmem:[#allocation8 + $0x2d4] ss:$20 sps:$4 sm:$0xff]  }
  0x8c   :  { %1617 = vmatpush1.bf16.msra.mxu1 %v2947_v49  ;;  %v3000_v49 = vld [vmem:[#allocation8 + $0x2dc] ss:$20 sps:$4 sm:$0xff]  }
  0x8d   :  { %1618 = vmatprep.subr.bf16.mxu1 %v2955_v50 }
  0x8e   :  { %1738 = vmatpush1.bf16.msra.mxu0 %v2944_v51  ;;  %v2995_v51 = vld [vmem:[#allocation8 + $0x2d0] ss:$20 sps:$4 sm:$0xff]  }
  0x8f   :  { %1739 = vmatprep.subr.bf16.mxu0 %v2952_v52  ;;  %v2998_v52 = vld [vmem:[#allocation8 + $0x2d8] ss:$20 sps:$4 sm:$0xff]  }
  0x90   :  { %1619 = vmatpush1.bf16.msra.mxu1 %v2953_v53  ;;  %v3003_v53 = vld [vmem:[#allocation8 + $0x2fc] ss:$20 sps:$4 sm:$0xff]  }
  0x91   :  { %1620 = vmatprep.subr.bf16.mxu1 %v2961_v54  ;;  %v3006_v54 = vld [vmem:[#allocation8 + $0x304] ss:$20 sps:$4 sm:$0xff]  }
  0x92   :  { %1740 = vmatpush1.bf16.msra.mxu0 %v2950_v55  ;;  %v3001_v55 = vld [vmem:[#allocation8 + $0x2f8] ss:$20 sps:$4 sm:$0xff]  }
  0x93   :  { %1741 = vmatprep.subr.bf16.mxu0 %v2958_v56  ;;  %v3004_v56 = vld [vmem:[#allocation8 + $0x300] ss:$20 sps:$4 sm:$0xff]  }
  0x94   :  { %1621 = vmatpush1.bf16.msra.mxu1 %v2959_v57  ;;  %v3009_v57 = vld [vmem:[#allocation8 + $0x324] ss:$20 sps:$4 sm:$0xff]  }
  0x95   :  { %1622 = vmatprep.subr.bf16.mxu1 %v2967_v58  ;;  %v3012_v58 = vld [vmem:[#allocation8 + $0x32c] ss:$20 sps:$4 sm:$0xff]  }
  0x96   :  { %1742 = vmatpush1.bf16.msra.mxu0 %v2956_v59  ;;  %v3007_v59 = vld [vmem:[#allocation8 + $0x320] ss:$20 sps:$4 sm:$0xff]  }
  0x97   :  { %1743 = vmatprep.subr.bf16.mxu0 %v2964_v60  ;;  %v3010_v60 = vld [vmem:[#allocation8 + $0x328] ss:$20 sps:$4 sm:$0xff]  }
  0x98   :  { %1623 = vmatpush1.bf16.msra.mxu1 %v2965_v61  ;;  %v3015_v61 = vld [vmem:[#allocation8 + $0x34c] ss:$20 sps:$4 sm:$0xff]  }
  0x99   :  { %1624 = vmatprep.subr.bf16.mxu1 %v2973_v2  ;;  %v3021_v2 = vld [vmem:[#allocation8 + $0x374] ss:$20 sps:$4 sm:$0xff]  }
  0x9a   :  { %1744 = vmatpush1.bf16.msra.mxu0 %v2962_v62  ;;  %v3018_v62 = vld [vmem:[#allocation8 + $0x354] ss:$20 sps:$4 sm:$0xff]  }
  0x9b   :  { %1745 = vmatprep.subr.bf16.mxu0 %v2970_v63  ;;  %v3013_v63 = vld [vmem:[#allocation8 + $0x348] ss:$20 sps:$4 sm:$0xff]  }
  0x9c   :  { %1625 = vmatpush1.bf16.msra.mxu1 %v2971_v4  ;;  %v3019_v4 = vld [vmem:[#allocation8 + $0x370] ss:$20 sps:$4 sm:$0xff]  }
  0x9d   :  { %1626 = vmatprep.subr.bf16.mxu1 %v2979_v6  ;;  %v3027_v6 = vld [vmem:[#allocation8 + $0x39c] ss:$20 sps:$4 sm:$0xff]  }
  0x9e   :  { %1746 = vmatpush1.bf16.msra.mxu0 %v2968_v1  ;;  %v3016_v1 = vld [vmem:[#allocation8 + $0x350] ss:$20 sps:$4 sm:$0xff]  }
  0x9f   :  { %1747 = vmatprep.subr.bf16.mxu0 %v2976_v3  ;;  %v3024_v3 = vld [vmem:[#allocation8 + $0x37c] ss:$20 sps:$4 sm:$0xff]  }
  0xa0   :  { %1627 = vmatpush1.bf16.msra.mxu1 %v2977_v9  ;;  %v3025_v9 = vld [vmem:[#allocation8 + $0x398] ss:$20 sps:$4 sm:$0xff]  }
  0xa1   :  { %1637 = vmatprep.subr.bf16.mxu1 %v2985_v11  ;;  %v3033_v11 = vld [vmem:[#allocation8 + $0x3c4] ss:$20 sps:$4 sm:$0xff]  }
  0xa2   :  { %1748 = vmatpush1.bf16.msra.mxu0 %v2974_v5  ;;  %v3022_v5 = vld [vmem:[#allocation8 + $0x378] ss:$20 sps:$4 sm:$0xff]  }
  0xa3   :  { %1749 = vmatprep.subr.bf16.mxu0 %v2982_v7  ;;  %v3030_v7 = vld [vmem:[#allocation8 + $0x3a4] ss:$20 sps:$4 sm:$0xff]  }
  0xa6   :  { %1750 = vmatpush1.bf16.msra.mxu0 %v2980_v10  ;;  %v3028_v10 = vld [vmem:[#allocation8 + $0x3a0] ss:$20 sps:$4 sm:$0xff]  }
  0xa7   :  { %1760 = vmatprep.subr.bf16.mxu0 %v2988_v12  ;;  %v3036_v12 = vld [vmem:[#allocation8 + $0x3cc] ss:$20 sps:$4 sm:$0xff]  }
 0x134   :  { %v191_v21 = vpop.f32.mrb[0].mxu0 }
 0x135   :  { %v192_v23 = vadd.f32 %v191_v21, %v105_v19  ;;  %v193_v24 = vpop.f32.mrb[1].mxu0  ;;  %v3034_v19 = vld [vmem:[#allocation8 + $0x3c8] ss:$20 sps:$4 sm:$0xff]  }
 0x136   :  { %v194_v25 = vadd.f32 %v193_v24, %v109_v20  ;;  %v195_v26 = vpop.f32.mrb[2].mxu0  ;;  %v3488_v27 = vpop.f32.mrb[0].mxu1  ;;  %v3039_v20 = vld [vmem:[#allocation8 + $0x3ec] ss:$20 sps:$4 sm:$0xff]   ;;  %v3042_v21 = vld [vmem:[#allocation8 + $0x3f4] ss:$20 sps:$4 sm:$0xff]  }
 0x137   :  { %v279_v28 = vmax.f32 %v192_v23, 0.0  ;;  %v196_v29 = vpop.f32.mrb[3].mxu0  ;;  %v234_v30 = vpop.f32.mrb[1].mxu1  ;;  %v3040_v23 = vld [vmem:[#allocation8 + $0x3f0] ss:$20 sps:$4 sm:$0xff]  }
 0x138   :  { %v280_v31 = vmax.f32 %v194_v25, 0.0  ;;  %v235_v32 = vadd.f32 %v234_v30, %v117_v22  ;;  %v236_v33 = vpop.f32.mrb[2].mxu1  ;;  %v3037_v22 = vld [vmem:[#allocation8 + $0x3e8] ss:$20 sps:$4 sm:$0xff]   ;;  %v3043_v26 = vld [vmem:[#allocation8 + $0x410] ss:$20 sps:$4 sm:$0xff]  }
 0x139   :  { %v237_v34 = vpop.f32.mrb[3].mxu1  ;;  %v3492_v39 = vpack.c.bf16 %v279_v28, %v279_v28  ;;  %v3045_v24 = vld [vmem:[#allocation8 + $0x414] ss:$20 sps:$4 sm:$0xff]   ;;  %v3048_v25 = vld [vmem:[#allocation8 + $0x41c] ss:$20 sps:$4 sm:$0xff]  }
 0x13a   :  { %v3490_v35 = vpack.c.bf16 %v280_v31, %v280_v31  ;;  %v282_v38 = vmax.f32 %v235_v32, 0.0  ;;  %v3046_v28 = vld [vmem:[#allocation8 + $0x418] ss:$20 sps:$4 sm:$0xff]   ;;  %v3051_v29 = vld [vmem:[#allocation8 + $0x43c] ss:$20 sps:$4 sm:$0xff]  }
 0x13b   :  { %v3054_v30 = vld [vmem:[#allocation8 + $0x444] ss:$20 sps:$4 sm:$0xff]   ;;  %v3052_v32 = vld [vmem:[#allocation8 + $0x440] ss:$20 sps:$4 sm:$0xff]  }
 0x13c   :  { %1628 = vmatprep.mubr.bf16.mxu1 %v3490_v35  ;;  %1751 = vmatprep.mubr.bf16.mxu0 %v3490_v35  ;;  %v3496_v42 = vpack.c.bf16 %v282_v38, %v282_v38  ;;  %v3498_v43 = vpop.f32.mrb[4].mxu0  ;;  %v3049_v31 = vld [vmem:[#allocation8 + $0x438] ss:$20 sps:$4 sm:$0xff]   ;;  %v3058_v38 = vld [vmem:[#allocation8 + $0x468] ss:$20 sps:$4 sm:$0xff]  }
 0x13d   :  { %1629 = vmatmul.mubr.bf16.vlgmr.msra.gmra.mrb[4].mxu1 %v3492_v39  ;;  %1752 = vmatmul.mubr.bf16.vlgmr.msra.gmra.mrb[8].mxu0 %v3492_v39  ;;  %v2805_v44 = vpop.f32.mrb[5].mxu0  ;;  %v3057_v33 = vld [vmem:[#allocation8 + $0x464] ss:$20 sps:$4 sm:$0xff]   ;;  %v3060_v34 = vld [vmem:[#allocation8 + $0x46c] ss:$20 sps:$4 sm:$0xff]  }
 0x13e   :  { %1638 = vmatpush1.bf16.msra.mxu1 %v2983_v36  ;;  %1761 = vmatpush1.bf16.msra.mxu0 %v2986_v37  ;;  %v276_v47 = vpop.f32.mrb[6].mxu0  ;;  %v112_v36 = vsub.s32 2, %v3472_v14  ;;  %v3055_v37 = vld [vmem:[#allocation8 + $0x460] ss:$20 sps:$4 sm:$0xff]  }
 0x13f   :  { %1639 = vmatprep.subr.bf16.mxu1 %v2991_v40  ;;  %1762 = vmatprep.subr.bf16.mxu0 %v2994_v41  ;;  %v2806_v50 = vpop.f32.mrb[7].mxu0  ;;  %v3063_v40 = vld [vmem:[#allocation8 + $0x48c] ss:$20 sps:$4 sm:$0xff]   ;;  %v3066_v41 = vld [vmem:[#allocation8 + $0x494] ss:$20 sps:$4 sm:$0xff]  }
 0x140   :  { %1669 = vmatprep.mubr.bf16.mxu1 %v3496_v42  ;;  %1792 = vmatprep.mubr.bf16.mxu0 %v3496_v42  ;;  %v113_v44 = vrot.slane %v3475_v16, %v112_v36  ;;  %v3069_v47 = vld [vmem:[#allocation8 + $0x4b4] ss:$20 sps:$4 sm:$0xff]   ;;  %v3067_v50 = vld [vmem:[#allocation8 + $0x4b0] ss:$20 sps:$4 sm:$0xff]  }
 0x142   :  { %1640 = vmatpush1.bf16.msra.mxu1 %v2989_v45  ;;  %1763 = vmatpush1.bf16.msra.mxu0 %v2992_v46  ;;  %v3061_v45 = vld [vmem:[#allocation8 + $0x488] ss:$20 sps:$4 sm:$0xff]   ;;  %v3064_v46 = vld [vmem:[#allocation8 + $0x490] ss:$20 sps:$4 sm:$0xff]  }
 0x143   :  { %1641 = vmatprep.subr.bf16.mxu1 %v2997_v48  ;;  %1764 = vmatprep.subr.bf16.mxu0 %v3000_v49  ;;  %v3072_v48 = vld [vmem:[#allocation8 + $0x4bc] ss:$20 sps:$4 sm:$0xff]   ;;  %v233_v49 = vadd.f32 %v3488_v27, %v113_v44  ;;  %v3079_v27 = vld [vmem:[#allocation8 + $0x500] ss:$20 sps:$4 sm:$0xff]   ;;  %v3131_v44 = vld [vmem:[#allocation8 + $0x178] ss:$20 sps:$4 sm:$0xff]  }
 0x146   :  { %1642 = vmatpush1.bf16.msra.mxu1 %v2995_v51  ;;  %1765 = vmatpush1.bf16.msra.mxu0 %v2998_v52  ;;  %v3070_v51 = vld [vmem:[#allocation8 + $0x4b8] ss:$20 sps:$4 sm:$0xff]   ;;  %v3075_v52 = vld [vmem:[#allocation8 + $0x4dc] ss:$20 sps:$4 sm:$0xff]  }
 0x147   :  { %1643 = vmatprep.subr.bf16.mxu1 %v3003_v53  ;;  %1766 = vmatprep.subr.bf16.mxu0 %v3006_v54  ;;  %v3078_v53 = vld [vmem:[#allocation8 + $0x4e4] ss:$20 sps:$4 sm:$0xff]   ;;  %v281_v54 = vmax.f32 %v233_v49, 0.0  ;;  %v3136_v49 = vld [vmem:[#allocation8 + $0x420] ss:$20 sps:$4 sm:$0xff]  }
 0x14a   :  { %1644 = vmatpush1.bf16.msra.mxu1 %v3001_v55  ;;  %1767 = vmatpush1.bf16.msra.mxu0 %v3004_v56  ;;  %v3073_v55 = vld [vmem:[#allocation8 + $0x4d8] ss:$20 sps:$4 sm:$0xff]   ;;  %v3076_v56 = vld [vmem:[#allocation8 + $0x4e0] ss:$20 sps:$4 sm:$0xff]  }
 0x14b   :  { %1645 = vmatprep.subr.bf16.mxu1 %v3009_v57  ;;  %1768 = vmatprep.subr.bf16.mxu0 %v3012_v58  ;;  %v3081_v57 = vld [vmem:[#allocation8 + $0x504] ss:$20 sps:$4 sm:$0xff]   ;;  %v3084_v58 = vld [vmem:[#allocation8 + $0x50c] ss:$20 sps:$4 sm:$0xff]  }
 0x14e   :  { %1646 = vmatpush1.bf16.msra.mxu1 %v3007_v59  ;;  %1769 = vmatpush1.bf16.msra.mxu0 %v3010_v60  ;;  %v3509_v59 = vpack.c.bf16 %v281_v54, %v281_v54  ;;  %v3082_v60 = vld [vmem:[#allocation8 + $0x508] ss:$20 sps:$4 sm:$0xff]  }
 0x14f   :  { %1647 = vmatprep.subr.bf16.mxu1 %v3015_v61  ;;  %1770 = vmatprep.subr.bf16.mxu0 %v3018_v62  ;;  %v3087_v61 = vld [vmem:[#allocation8 + $0x52c] ss:$20 sps:$4 sm:$0xff]   ;;  %v3090_v62 = vld [vmem:[#allocation8 + $0x534] ss:$20 sps:$4 sm:$0xff]  }
 0x150   :  { %v3141_v54 = vld [vmem:[#allocation8 + $0x88] ss:$20 sps:$4 sm:$0xff]  }
 0x152   :  { %1648 = vmatpush1.bf16.msra.mxu1 %v3013_v63  ;;  %1771 = vmatpush1.bf16.msra.mxu0 %v3016_v1  ;;  %v3085_v63 = vld [vmem:[#allocation8 + $0x528] ss:$20 sps:$4 sm:$0xff]   ;;  %v3088_v1 = vld [vmem:[#allocation8 + $0x530] ss:$20 sps:$4 sm:$0xff]  }
 0x153   :  { %1649 = vmatprep.subr.bf16.mxu1 %v3021_v2  ;;  %1772 = vmatprep.subr.bf16.mxu0 %v3024_v3  ;;  %v3093_v2 = vld [vmem:[#allocation8 + $0x554] ss:$20 sps:$4 sm:$0xff]   ;;  %v3096_v3 = vld [vmem:[#allocation8 + $0x55c] ss:$20 sps:$4 sm:$0xff]  }
 0x156   :  { %1650 = vmatpush1.bf16.msra.mxu1 %v3019_v4  ;;  %1773 = vmatpush1.bf16.msra.mxu0 %v3022_v5  ;;  %v3091_v4 = vld [vmem:[#allocation8 + $0x550] ss:$20 sps:$4 sm:$0xff]   ;;  %v3094_v5 = vld [vmem:[#allocation8 + $0x558] ss:$20 sps:$4 sm:$0xff]  }
 0x157   :  { %1651 = vmatprep.subr.bf16.mxu1 %v3027_v6  ;;  %1774 = vmatprep.subr.bf16.mxu0 %v3030_v7  ;;  %v3099_v6 = vld [vmem:[#allocation8 + $0x57c] ss:$20 sps:$4 sm:$0xff]   ;;  %v3102_v7 = vld [vmem:[#allocation8 + $0x584] ss:$20 sps:$4 sm:$0xff]  }
 0x15a   :  { %1652 = vmatpush1.bf16.msra.mxu1 %v3025_v9  ;;  %1775 = vmatpush1.bf16.msra.mxu0 %v3028_v10  ;;  %v3097_v9 = vld [vmem:[#allocation8 + $0x578] ss:$20 sps:$4 sm:$0xff]   ;;  %v3100_v10 = vld [vmem:[#allocation8 + $0x580] ss:$20 sps:$4 sm:$0xff]  }
 0x15b   :  { %1653 = vmatprep.subr.bf16.mxu1 %v3033_v11  ;;  %1776 = vmatprep.subr.bf16.mxu0 %v3036_v12  ;;  %v3105_v11 = vld [vmem:[#allocation8 + $0x5a4] ss:$20 sps:$4 sm:$0xff]   ;;  %v3108_v12 = vld [vmem:[#allocation8 + $0x5ac] ss:$20 sps:$4 sm:$0xff]  }
 0x15e   :  { %1654 = vmatpush1.bf16.msra.mxu1 %v3031_v13  ;;  %1777 = vmatpush1.bf16.msra.mxu0 %v3034_v19  ;;  %v120_v13 = vsub.s32 4, %v3472_v14  ;;  %v3106_v19 = vld [vmem:[#allocation8 + $0x5a8] ss:$20 sps:$4 sm:$0xff]  }
 0x15f   :  { %1655 = vmatprep.subr.bf16.mxu1 %v3039_v20  ;;  %1778 = vmatprep.subr.bf16.mxu0 %v3042_v21  ;;  %v3111_v20 = vld [vmem:[#allocation8 + $0x5cc] ss:$20 sps:$4 sm:$0xff]   ;;  %v3114_v21 = vld [vmem:[#allocation8 + $0x5d4] ss:$20 sps:$4 sm:$0xff]  }
 0x162   :  { %1656 = vmatpush1.bf16.msra.mxu1 %v3037_v22  ;;  %1779 = vmatpush1.bf16.msra.mxu0 %v3040_v23  ;;  %v121_v22 = vrot.slane %v3475_v16, %v120_v13  ;;  %v3109_v23 = vld [vmem:[#allocation8 + $0x5c8] ss:$20 sps:$4 sm:$0xff]   ;;  %v3121_v16 = vld [vmem:[#allocation8 + $0x618] ss:$20 sps:$4 sm:$0xff]  }
 0x163   :  { %1657 = vmatprep.subr.bf16.mxu1 %v3045_v24  ;;  %1780 = vmatprep.subr.bf16.mxu0 %v3048_v25  ;;  %v3112_v24 = vld [vmem:[#allocation8 + $0x5d0] ss:$20 sps:$4 sm:$0xff]   ;;  %v3117_v25 = vld [vmem:[#allocation8 + $0x5f4] ss:$20 sps:$4 sm:$0xff]  }
 0x166   :  { %1658 = vmatpush1.bf16.msra.mxu1 %v3043_v26  ;;  %1781 = vmatpush1.bf16.msra.mxu0 %v3046_v28  ;;  %v3120_v26 = vld [vmem:[#allocation8 + $0x5fc] ss:$20 sps:$4 sm:$0xff]   ;;  %v274_v28 = vadd.f32 %v3498_v43, %v121_v22 }
 0x167   :  { %1659 = vmatprep.subr.bf16.mxu1 %v3051_v29  ;;  %1782 = vmatprep.subr.bf16.mxu0 %v3054_v30  ;;  %v3115_v29 = vld [vmem:[#allocation8 + $0x5f0] ss:$20 sps:$4 sm:$0xff]   ;;  %v3118_v30 = vld [vmem:[#allocation8 + $0x5f8] ss:$20 sps:$4 sm:$0xff]  }
 0x168   :  { %v3129_v43 = vld [vmem:[#allocation8 + $0x10] ss:$20 sps:$4 sm:$0xff]   ;;  %v3181_v22 = vld [vmem:[#allocation10 + $0x18] sm:$0xff]  }
 0x16a   :  { %1660 = vmatpush1.bf16.msra.mxu1 %v3049_v31  ;;  %1783 = vmatpush1.bf16.msra.mxu0 %v3052_v32  ;;  %v3123_v31 = vld [vmem:[#allocation8 + $0x61c] ss:$20 sps:$4 sm:$0xff]   ;;  %v3126_v32 = vld [vmem:[#allocation8 + $0x624] ss:$20 sps:$4 sm:$0xff]  }
 0x16b   :  { %1661 = vmatprep.subr.bf16.mxu1 %v3057_v33  ;;  %1784 = vmatprep.subr.bf16.mxu0 %v3060_v34  ;;  %v283_v33 = vmax.f32 %v274_v28, 0.0  ;;  %v3124_v34 = vld [vmem:[#allocation8 + $0x620] ss:$20 sps:$4 sm:$0xff]   ;;  %v3164_v28 = vld [vmem:[#allocation8 + $0x5d8] ss:$20 sps:$4 sm:$0xff]  }
 0x16e   :  { %1662 = vmatpush1.bf16.msra.mxu1 %v3055_v37  ;;  %1785 = vmatpush1.bf16.msra.mxu0 %v3058_v38  ;;  %v3127_v37 = vld [vmem:[#allocation8 + $0x150] ss:$20 sps:$4 sm:$0xff]  }
 0x16f   :  { %1663 = vmatprep.subr.bf16.mxu1 %v3063_v40  ;;  %1786 = vmatprep.subr.bf16.mxu0 %v3066_v41  ;;  %v3128_v38 = vld [vmem:[#allocation8 + $0x3d0] ss:$20 sps:$4 sm:$0xff]   ;;  %v3520_v40 = vpack.c.bf16 %v283_v33, %v283_v33 }
 0x170   :  { %v3130_v41 = vld [vmem:[#allocation8 + $0x290] ss:$20 sps:$4 sm:$0xff]  }
 0x171   :  { %v3170_v33 = vld [vmem:[#allocation10 + $0x80] sm:$0xff]  }
 0x172   :  { %1664 = vmatpush1.bf16.msra.mxu1 %v3061_v45  ;;  %1787 = vmatpush1.bf16.msra.mxu0 %v3064_v46  ;;  %v3132_v45 = vld [vmem:[#allocation8 + $0x3f8] ss:$20 sps:$4 sm:$0xff]  }
 0x173   :  { %1665 = vmatprep.subr.bf16.mxu1 %v3069_v47  ;;  %1788 = vmatprep.subr.bf16.mxu0 %v3072_v48  ;;  %v3133_v46 = vld [vmem:[#allocation8 + $0x38] ss:$20 sps:$4 sm:$0xff]   ;;  %v3135_v48 = vld [vmem:[#allocation8 + $0x1a0] ss:$20 sps:$4 sm:$0xff]  }
 0x174   :  { %v3134_v47 = vld [vmem:[#allocation8 + $0x2b8] ss:$20 sps:$4 sm:$0xff]  }
 0x176   :  { %1666 = vmatpush1.bf16.msra.mxu1 %v3067_v50  ;;  %1789 = vmatpush1.bf16.msra.mxu0 %v3070_v51  ;;  %v3137_v50 = vld [vmem:[#allocation8 + $0x60] ss:$20 sps:$4 sm:$0xff]  }
 0x177   :  { %1667 = vmatprep.subr.bf16.mxu1 %v3075_v52  ;;  %1790 = vmatprep.subr.bf16.mxu0 %v3078_v53  ;;  %v3138_v51 = vld [vmem:[#allocation8 + $0x2e0] ss:$20 sps:$4 sm:$0xff]   ;;  %v3139_v52 = vld [vmem:[#allocation8 + $0x1c8] ss:$20 sps:$4 sm:$0xff]  }
 0x178   :  { %v3140_v53 = vld [vmem:[#allocation8 + $0x448] ss:$20 sps:$4 sm:$0xff]  }
 0x17a   :  { %1668 = vmatpush1.bf16.msra.mxu1 %v3073_v55  ;;  %1791 = vmatpush1.bf16.msra.mxu0 %v3076_v56  ;;  %v3143_v55 = vld [vmem:[#allocation8 + $0x1f0] ss:$20 sps:$4 sm:$0xff]  }
 0x17b   :  { %1678 = vmatprep.subr.bf16.mxu1 %v3081_v57  ;;  %1801 = vmatprep.subr.bf16.mxu0 %v3084_v58  ;;  %v3145_v56 = vld [vmem:[#allocation8 + $0xb0] ss:$20 sps:$4 sm:$0xff]   ;;  %v3147_v58 = vld [vmem:[#allocation8 + $0x218] ss:$20 sps:$4 sm:$0xff]  }
 0x17c   :  { %v3146_v57 = vld [vmem:[#allocation8 + $0x330] ss:$20 sps:$4 sm:$0xff]  }
 0x17d   :  { %1670 = vmatmul.mubr.bf16.vlgmr.msra.gmra.mrb[4].mxu1 %v3509_v59  ;;  %1793 = vmatmul.mubr.bf16.vlgmr.msra.gmra.mrb[8].mxu0 %v3509_v59 }
 0x17e   :  { %1679 = vmatpush1.bf16.msra.mxu1 %v3079_v27  ;;  %1802 = vmatpush1.bf16.msra.mxu0 %v3082_v60  ;;  %v3148_v27 = vld [vmem:[#allocation8 + $0x498] ss:$20 sps:$4 sm:$0xff]  }
 0x17f   :  { %1680 = vmatprep.subr.bf16.mxu1 %v3087_v61  ;;  %1803 = vmatprep.subr.bf16.mxu0 %v3090_v62  ;;  %v3149_v60 = vld [vmem:[#allocation8 + $0xd8] ss:$20 sps:$4 sm:$0xff]   ;;  %v3151_v62 = vld [vmem:[#allocation8 + $0x240] ss:$20 sps:$4 sm:$0xff]  }
 0x180   :  { %1710 = vmatprep.mubr.bf16.mxu1 %v3360_v0  ;;  %1833 = vmatprep.mubr.bf16.mxu0 %v3360_v0  ;;  %v3103_v0 = vld [vmem:[#allocation8 + $0x5a0] ss:$20 sps:$4 sm:$0xff]   ;;  %v3150_v61 = vld [vmem:[#allocation8 + $0x358] ss:$20 sps:$4 sm:$0xff]  }
 0x182   :  { %1681 = vmatpush1.bf16.msra.mxu1 %v3085_v63  ;;  %1804 = vmatpush1.bf16.msra.mxu0 %v3088_v1  ;;  %v3152_v63 = vld [vmem:[#allocation8 + $0x4c0] ss:$20 sps:$4 sm:$0xff]  }
 0x183   :  { %1682 = vmatprep.subr.bf16.mxu1 %v3093_v2  ;;  %1805 = vmatprep.subr.bf16.mxu0 %v3096_v3  ;;  %v3153_v1 = vld [vmem:[#allocation8 + $0x100] ss:$20 sps:$4 sm:$0xff]   ;;  %v3155_v3 = vld [vmem:[#allocation8 + $0x268] ss:$20 sps:$4 sm:$0xff]  }
 0x184   :  { %v3154_v2 = vld [vmem:[#allocation8 + $0x380] ss:$20 sps:$4 sm:$0xff]  }
 0x186   :  { %1683 = vmatpush1.bf16.msra.mxu1 %v3091_v4  ;;  %1806 = vmatpush1.bf16.msra.mxu0 %v3094_v5  ;;  %v3156_v4 = vld [vmem:[#allocation8 + $0x4e8] ss:$20 sps:$4 sm:$0xff]  }
 0x187   :  { %1684 = vmatprep.subr.bf16.mxu1 %v3099_v6  ;;  %1807 = vmatprep.subr.bf16.mxu0 %v3102_v7  ;;  %v3157_v5 = vld [vmem:[#allocation8 + $0x128] ss:$20 sps:$4 sm:$0xff]   ;;  %v3167_v7 = vld [vmem:[#allocation10 + $0x40] sm:$0xff]  }
 0x188   :  { %v3158_v6 = vld [vmem:[#allocation8 + $0x3a8] ss:$20 sps:$4 sm:$0xff]  }
 0x18a   :  { %1685 = vmatpush1.bf16.msra.mxu1 %v3097_v9  ;;  %1808 = vmatpush1.bf16.msra.mxu0 %v3100_v10  ;;  %v3159_v9 = vld [vmem:[#allocation8 + $0x510] ss:$20 sps:$4 sm:$0xff]  }
 0x18b   :  { %1686 = vmatprep.subr.bf16.mxu1 %v3105_v11  ;;  %1809 = vmatprep.subr.bf16.mxu0 %v3108_v12  ;;  %v3169_v10 = vld [vmem:[#allocation10] sm:$0xff]   ;;  %v3171_v11 = vld [vmem:[#allocation10 + $0x48] sm:$0xff]  }
 0x18c   :  { %v3160_v12 = vld [vmem:[#allocation8 + $0x538] ss:$20 sps:$4 sm:$0xff]  }
 0x18e   :  { %1687 = vmatpush1.bf16.msra.mxu1 %v3103_v0  ;;  %1810 = vmatpush1.bf16.msra.mxu0 %v3106_v19  ;;  %v3173_v0 = vld [vmem:[#allocation10 + $0x8] sm:$0xff]   ;;  %v3175_v19 = vld [vmem:[#allocation10 + $0x50] sm:$0xff]  }
 0x18f   :  { %1688 = vmatprep.subr.bf16.mxu1 %v3111_v20  ;;  %1811 = vmatprep.subr.bf16.mxu0 %v3114_v21  ;;  %v3161_v20 = vld [vmem:[#allocation8 + $0x560] ss:$20 sps:$4 sm:$0xff]   ;;  %v3179_v21 = vld [vmem:[#allocation10 + $0x58] sm:$0xff]  }
 0x192   :  { %1689 = vmatpush1.bf16.msra.mxu1 %v3109_v23  ;;  %1812 = vmatpush1.bf16.msra.mxu0 %v3112_v24  ;;  %v3183_v23 = vld [vmem:[#allocation10 + $0x60] sm:$0xff]  }
 0x193   :  { %1690 = vmatprep.subr.bf16.mxu1 %v3117_v25  ;;  %1813 = vmatprep.subr.bf16.mxu0 %v3120_v26  ;;  %v3163_v24 = vld [vmem:[#allocation8 + $0x5b0] ss:$20 sps:$4 sm:$0xff]   ;;  %v3187_v26 = vld [vmem:[#allocation10 + $0x68] sm:$0xff]  }
 0x194   :  { %v3185_v25 = vld [vmem:[#allocation10 + $0x20] sm:$0xff]  }
 0x196   :  { %1691 = vmatpush1.bf16.msra.mxu1 %v3115_v29  ;;  %1814 = vmatpush1.bf16.msra.mxu0 %v3118_v30  ;;  %v3189_v29 = vld [vmem:[#allocation10 + $0x28] sm:$0xff]   ;;  %v3165_v30 = vld [vmem:[#allocation8 + $0x600] ss:$20 sps:$4 sm:$0xff]  }
 0x197   :  { %1692 = vmatprep.subr.bf16.mxu1 %v3123_v31  ;;  %1815 = vmatprep.subr.bf16.mxu0 %v3126_v32  ;;  %v3166_v31 = vld [vmem:[#allocation8 + $0x628] ss:$20 sps:$4 sm:$0xff]   ;;  %v3168_v32 = vld [vmem:[#allocation10 + $0xc0] sm:$0xff]  }
 0x19a   :  { %1693 = vmatpush1.bf16.msra.mxu1 %v3121_v16  ;;  %1816 = vmatpush1.bf16.msra.mxu0 %v3124_v34  ;;  %v3172_v16 = vld [vmem:[#allocation10 + $0xc8] sm:$0xff]  }
 0x19b   :  { %2695 = vmatprep.subr.bf16.mxu1 %v3127_v37  ;;  %2717 = vmatprep.subr.bf16.mxu0 %v3128_v38  ;;  %v3174_v34 = vld [vmem:[#allocation10 + $0x88] sm:$0xff]   ;;  %v3176_v37 = vld [vmem:[#allocation10 + $0xd0] sm:$0xff]  }
 0x19c   :  { %v3178_v38 = vld [vmem:[#allocation10 + $0x90] sm:$0xff]  }
 0x19d   :  { %1711 = vmatmul.mubr.bf16.vlgmr.msra.gmra.mrb[4].mxu1 %v3520_v40  ;;  %1834 = vmatmul.mubr.bf16.vlgmr.msra.gmra.mrb[8].mxu0 %v3520_v40 }
 0x19e   :  { %2696 = vmatpush3.bf16.msra.mxu1 %v3129_v43  ;;  %1874 = vmatprep.mubr.bf16.mxu1 %v3490_v35  ;;  %v3142_v35 = vld [vmem:[#allocation8 + $0x308] ss:$20 sps:$4 sm:$0xff]  }
 0x19f   :  { %2718 = vmatpush3.bf16.msra.mxu0 %v3130_v41  ;;  %1914 = vmatprep.mubr.bf16.mxu0 %v3496_v42  ;;  %v3144_v42 = vld [vmem:[#allocation8 + $0x470] ss:$20 sps:$4 sm:$0xff]   ;;  %v3180_v43 = vld [vmem:[#allocation10 + $0xd8] sm:$0xff]  }
 0x1a0   :  { %2697 = vmatprep.subr.bf16.mxu1 %v3131_v44  ;;  %2719 = vmatprep.subr.bf16.mxu0 %v3132_v45  ;;  %v3182_v41 = vld [vmem:[#allocation10 + $0x98] sm:$0xff]   ;;  %v3184_v44 = vld [vmem:[#allocation10 + $0xe0] sm:$0xff]  }
 0x1a1   :  { %v3186_v45 = vld [vmem:[#allocation10 + $0xa0] sm:$0xff]  }
 0x1a2   :  { %2698 = vmatpush3.bf16.msra.mxu1 %v3133_v46  ;;  %v3188_v46 = vld [vmem:[#allocation10 + $0xe8] sm:$0xff]  }
 0x1a3   :  { %2720 = vmatpush3.bf16.msra.mxu0 %v3134_v47  ;;  %2699 = vmatprep.subr.bf16.mxu1 %v3135_v48  ;;  %v3190_v47 = vld [vmem:[#allocation10 + $0xa8] sm:$0xff]   ;;  %v3192_v48 = vld [vmem:[#allocation10 + $0xf0] sm:$0xff]  }
 0x1a4   :  { %2721 = vmatprep.subr.bf16.mxu0 %v3136_v49  ;;  %v3193_v49 = vld [vmem:[#allocation10 + $0x30] sm:$0xff]  }
 0x1a6   :  { %2700 = vmatpush3.bf16.msra.mxu1 %v3137_v50  ;;  %v3194_v50 = vld [vmem:[#allocation10 + $0xb0] sm:$0xff]  }
 0x1a7   :  { %2722 = vmatpush3.bf16.msra.mxu0 %v3138_v51  ;;  %2701 = vmatprep.subr.bf16.mxu1 %v3139_v52  ;;  %v3195_v51 = vld [vmem:[#allocation10 + $0x78] sm:$0xff]  }
 0x1a8   :  { %2723 = vmatprep.subr.bf16.mxu0 %v3140_v53  ;;  %v3196_v52 = vld [vmem:[#allocation10 + $0xf8] sm:$0xff]  }
 0x1a9   :  { %v3197_v53 = vld [vmem:[#allocation10 + $0x38] sm:$0xff]  }
 0x1aa   :  { %2702 = vmatpush3.bf16.msra.mxu1 %v3141_v54  ;;  %v3198_v54 = vld [vmem:[#allocation10 + $0xb8] sm:$0xff]  }
 0x1ab   :  { %2724 = vmatpush3.bf16.msra.mxu0 %v3142_v35  ;;  %2703 = vmatprep.subr.bf16.mxu1 %v3143_v55  ;;  %v529_v35 = vld [vmem:[%s3581_s4] sm:$0x1f] }
 0x1ac   :  { %2725 = vmatprep.subr.bf16.mxu0 %v3144_v42  ;;  %v534_v55 = vrot.slane %v529_v35, %v104_v15  ;;  %v542_v42 = vrot.slane %v529_v35, %v112_v36 }
 0x1ae   :  { %2704 = vmatpush3.bf16.msra.mxu1 %v3145_v56  ;;  %v538_v56 = vrot.slane %v529_v35, %v108_v17 }
 0x1af   :  { %2726 = vmatpush3.bf16.msra.mxu0 %v3146_v57  ;;  %2705 = vmatprep.subr.bf16.mxu1 %v3147_v58  ;;  %v546_v57 = vrot.slane %v529_v35, %v116_v18 }
 0x1b0   :  { %2727 = vmatprep.subr.bf16.mxu0 %v3148_v27 }
 0x1b2   :  { %2706 = vmatpush3.bf16.msra.mxu1 %v3149_v60 }
 0x1b3   :  { %2728 = vmatpush3.bf16.msra.mxu0 %v3150_v61  ;;  %2707 = vmatprep.subr.bf16.mxu1 %v3151_v62 }
 0x1b4   :  { %2729 = vmatprep.subr.bf16.mxu0 %v3152_v63 }
 0x1b6   :  { %2708 = vmatpush3.bf16.msra.mxu1 %v3153_v1 }
 0x1b7   :  { %2730 = vmatpush3.bf16.msra.mxu0 %v3154_v2  ;;  %2709 = vmatprep.subr.bf16.mxu1 %v3155_v3 }
 0x1b8   :  { %2731 = vmatprep.subr.bf16.mxu0 %v3156_v4 }
 0x1ba   :  { %2710 = vmatpush3.bf16.msra.mxu1 %v3157_v5 }
 0x1bb   :  { %2732 = vmatpush3.bf16.msra.mxu0 %v3158_v6  ;;  %2807 = vmatprep.subr.bf16.mxu1 %v3361_v8 }
 0x1bc   :  { %2748 = vmatprep.subr.bf16.mxu0 %v3167_v7 }
 0x1bd   :  { %1875 = vmatmul.mubr.bf16.vlgmr.msra.gmra.mrb[8].mxu1 %v3492_v39  ;;  %v3177_v39 = vld [vmem:[#allocation10 + $0x10] sm:$0xff]  }
 0x1be   :  { %1915 = vmatmul.mubr.bf16.vlgmr.msra.gmra.mrb[12].mxu0 %v3509_v59  ;;  %2808 = vmatpush3.bf16.msra.mxu1 %v3159_v9  ;;  %v3162_v59 = vld [vmem:[#allocation8 + $0x588] ss:$20 sps:$4 sm:$0xff]  }
 0x1bf   :  { %2809 = vmatprep.subr.bf16.mxu1 %v3361_v8  ;;  %2823 = vmatprep.mubr.msk.bf16.mxu1 %vm3362_vm1, %v3361_v8 }
 0x1c0   :  { %2749 = vmatpush3.bf16.msra.mxu0 %v3169_v10 }
 0x1c1   :  { %2750 = vmatprep.subr.bf16.mxu0 %v3171_v11  ;;  %v3199_v11 = vld [vmem:[#allocation10 + $0x100] sm:$0xff]  }
 0x1c2   :  { %2810 = vmatpush3.bf16.msra.mxu1 %v3160_v12 }
 0x1c3   :  { %2811 = vmatprep.subr.bf16.mxu1 %v3361_v8 }
 0x1c4   :  { %2751 = vmatpush3.bf16.msra.mxu0 %v3173_v0  ;;  %v3200_v0 = vld [vmem:[#allocation10 + $0x108] sm:$0xff]  }
 0x1c5   :  { %2752 = vmatprep.subr.bf16.mxu0 %v3175_v19  ;;  %v3201_v19 = vld [vmem:[#allocation10 + $0x110] sm:$0xff]  }
 0x1c6   :  { %2812 = vmatpush3.bf16.msra.mxu1 %v3161_v20  ;;  %v3202_v20 = vld [vmem:[#allocation10 + $0x118] sm:$0xff]  }
 0x1c7   :  { %2813 = vmatprep.subr.bf16.mxu1 %v3361_v8 }
 0x1c8   :  { %2753 = vmatpush3.bf16.msra.mxu0 %v3177_v39  ;;  %v3203_v39 = vld [vmem:[#allocation10 + $0x120] sm:$0xff]  }
 0x1c9   :  { %2754 = vmatprep.subr.bf16.mxu0 %v3179_v21  ;;  %v3204_v21 = vld [vmem:[#allocation10 + $0x128] sm:$0xff]  }
 0x1ca   :  { %2814 = vmatpush3.bf16.msra.mxu1 %v3162_v59  ;;  %v3205_v59 = vld [vmem:[#allocation10 + $0x130] sm:$0xff]  }
 0x1cb   :  { %2815 = vmatprep.subr.bf16.mxu1 %v3361_v8 }
 0x1cc   :  { %2755 = vmatpush3.bf16.msra.mxu0 %v3181_v22 }
 0x1cd   :  { %2756 = vmatprep.subr.bf16.mxu0 %v3183_v23  ;;  %v550_v23 = vrot.slane %v529_v35, %v120_v13 }
 0x1ce   :  { %2816 = vmatpush3.bf16.msra.mxu1 %v3163_v24 }
 0x1cf   :  { %2817 = vmatprep.subr.bf16.mxu1 %v3361_v8 }
 0x1d0   :  { %2757 = vmatpush3.bf16.msra.mxu0 %v3185_v25 }
 0x1d1   :  { %2758 = vmatprep.subr.bf16.mxu0 %v3187_v26 }
 0x1d2   :  { %2818 = vmatpush3.bf16.msra.mxu1 %v3164_v28 }
 0x1d3   :  { %2819 = vmatprep.subr.bf16.mxu1 %v3361_v8 }
 0x1d4   :  { %2759 = vmatpush3.bf16.msra.mxu0 %v3189_v29 }
 0x1d6   :  { %2820 = vmatpush3.bf16.msra.mxu1 %v3165_v30  ;;  %v3206_v30 = vld [vmem:[#allocation10 + $0x138] sm:$0xff]  }
 0x1d7   :  { %2821 = vmatprep.subr.bf16.mxu1 %v3361_v8 }
 0x1da   :  { %2822 = vmatpush3.bf16.msra.mxu1 %v3166_v31 }
 0x1db   :  { %2770 = vmatprep.subr.bf16.mxu1 %v3168_v32 }
 0x1dd   :  { %2824 = vmatmul.mubr.bf16.vlgmr.msra.gmra.mrb[12].mxu1 %v3520_v40  ;;  %v3191_v40 = vld [vmem:[#allocation10 + $0x70] sm:$0xff]  }
 0x1de   :  { %2771 = vmatpush3.bf16.msra.mxu1 %v3170_v33  ;;  %2760 = vmatprep.subr.bf16.mxu0 %v3191_v40  ;;  %v2651_v40 = vld [vmem:[%s3583_s6] ss:$0 sm:$0xff]  ;;  %s3363_s6 = smov [#allocation11]  }
 0x1df   :  { %2772 = vmatprep.subr.bf16.mxu1 %v3172_v16  ;;  %2761 = vmatpush3.bf16.msra.mxu0 %v3193_v49  ;;  %s2432_s16 = sshll.u32 %s3363_s6, 4  ;;  %s2433_s16 = int_to_ptr.vmem [resolvable:$true] %s2432_s16 }
 0x1e0   :  { %2762 = vmatprep.subr.bf16.mxu0 %v3195_v51  ;;  %s3321_s17 = scalar_lea.vmem %s2433_s16, 32  ;;  %p3326_p13 = scmp.lt.s32.totalorder %s2433_s16, %s2433_s16 }
 0x1e1   :  { %p3322_p12 = scmp.ne.s32.totalorder %s2433_s16, %s3321_s17  ;;  %p3327_p0 = scmp.lt.s32.totalorder %s3321_s17, %s3321_s17 }
 0x1e2   :  { %2773 = vmatpush3.bf16.msra.mxu1 %v3174_v34 }
 0x1e3   :  { %2774 = vmatprep.subr.bf16.mxu1 %v3176_v37  ;;  %2763 = vmatpush3.bf16.msra.mxu0 %v3197_v53  ;;  %p3328_p1 = por %p3327_p0, %p3326_p13 }
 0x1e4   :  { %2827 = vmatprep.subr.bf16.mxu0 %v3361_v8 }
 0x1e5   :  { %p3329_p2 = pnand %p3328_p1, %p3322_p12 }
 0x1e6   :  { %2775 = vmatpush3.bf16.msra.mxu1 %v3178_v38 }
 0x1e7   :  { %2776 = vmatprep.subr.bf16.mxu1 %v3180_v43 }
 0x1ea   :  { %2777 = vmatpush3.bf16.msra.mxu1 %v3182_v41 }
 0x1eb   :  { %2778 = vmatprep.subr.bf16.mxu1 %v3184_v44 }
 0x1ee   :  { %2779 = vmatpush3.bf16.msra.mxu1 %v3186_v45 }
 0x1ef   :  { %2780 = vmatprep.subr.bf16.mxu1 %v3188_v46 }
 0x1f2   :  { %2781 = vmatpush3.bf16.msra.mxu1 %v3190_v47 }
 0x1f3   :  { %2782 = vmatprep.subr.bf16.mxu1 %v3192_v48 }
 0x1f6   :  { %2783 = vmatpush3.bf16.msra.mxu1 %v3194_v50 }
 0x1f7   :  { %2784 = vmatprep.subr.bf16.mxu1 %v3196_v52 }
 0x1fa   :  { %2785 = vmatpush3.bf16.msra.mxu1 %v3198_v54 }
 0x270   :  { %v1712_v58 = vpop.f32.mrb[4].mxu1  ;;  %v1835_v27 = vpop.f32.mrb[8].mxu0 }
 0x271   :  { %v2847_v60 = vadd.f32 %v1712_v58, %v534_v55  ;;  %v2849_v61 = vadd.f32 %v1835_v27, %v542_v42  ;;  %v1714_v62 = vpop.f32.mrb[5].mxu1  ;;  %v1837_v63 = vpop.f32.mrb[9].mxu0 }
 0x272   :  { %v2848_v1 = vadd.f32 %v1714_v62, %v538_v56  ;;  %v2850_v2 = vadd.f32 %v1837_v63, %v546_v57  ;;  %v1716_v3 = vpop.f32.mrb[6].mxu1  ;;  %v1839_v4 = vpop.f32.mrb[10].mxu0 }
 0x273   :  { %v1962_v15 = vmax.f32 %v2847_v60, 0.0  ;;  %v1964_v5 = vmax.f32 %v2849_v61, 0.0  ;;  %v1717_v6 = vpop.f32.mrb[7].mxu1  ;;  %v1840_v36 = vpop.f32.mrb[11].mxu0 }
 0x274   :  { %v1963_v7 = vmax.f32 %v2848_v1, 0.0  ;;  %v1965_v9 = vmax.f32 %v2850_v2, 0.0 }
 0x275   :  { %v1967_v18 = vpack.c.bf16 %v1962_v15, %v1962_v15  ;;  %v1969_v12 = vpack.c.bf16 %v1964_v5, %v1964_v5 }
 0x276   :  { %v1968_v17 = vpack.c.bf16 %v1963_v7, %v1963_v7  ;;  %v1970_v10 = vpack.c.bf16 %v1965_v9, %v1965_v9 }
 0x278   :  { %2331 = vmatprep.mubr.bf16.mxu0 %v1968_v17  ;;  %2371 = vmatprep.mubr.bf16.mxu1 %v1970_v10 }
 0x279   :  { %2332 = vmatmul.mubr.bf16.vlgmr.msra.gmra.mrb[16].mxu0 %v1967_v18  ;;  %2372 = vmatmul.mubr.bf16.vlgmr.msra.gmra.mrb[16].mxu1 %v1969_v12 }
 0x27a   :  { %2828 = vmatpush3.bf16.msra.mxu0 %v3199_v11  ;;  %2843 = vmatprep.mubr.msk.bf16.mxu0 %vm3362_vm1, %v3361_v8 }
 0x27b   :  { %2829 = vmatprep.subr.bf16.mxu0 %v3361_v8 }
 0x27e   :  { %2830 = vmatpush3.bf16.msra.mxu0 %v3200_v0 }
 0x27f   :  { %2831 = vmatprep.subr.bf16.mxu0 %v3361_v8 }
 0x282   :  { %2832 = vmatpush3.bf16.msra.mxu0 %v3201_v19 }
 0x283   :  { %2833 = vmatprep.subr.bf16.mxu0 %v3361_v8 }
 0x286   :  { %2834 = vmatpush3.bf16.msra.mxu0 %v3202_v20 }
 0x287   :  { %2835 = vmatprep.subr.bf16.mxu0 %v3361_v8 }
 0x28a   :  { %2836 = vmatpush3.bf16.msra.mxu0 %v3203_v39 }
 0x28b   :  { %2837 = vmatprep.subr.bf16.mxu0 %v3361_v8 }
 0x28e   :  { %2838 = vmatpush3.bf16.msra.mxu0 %v3204_v21 }
 0x28f   :  { %2839 = vmatprep.subr.bf16.mxu0 %v3361_v8 }
 0x290   :  { %v2711_v22 = vpop.f32.mrb[8].mxu1 }
 0x291   :  { %v2733_v24 = vpop.f32.mrb[12].mxu0  ;;  %v2712_v25 = vpop.f32.mrb[9].mxu1 }
 0x292   :  { %v2713_v26 = vadd.f32 %v2712_v25, %v2711_v22  ;;  %v2734_v28 = vpop.f32.mrb[13].mxu0  ;;  %v2714_v29 = vpop.f32.mrb[10].mxu1  ;;  %2840 = vmatpush3.bf16.msra.mxu0 %v3205_v59 }
 0x293   :  { %v2735_v31 = vadd.f32 %v2734_v28, %v2733_v24  ;;  %v2736_v32 = vpop.f32.mrb[14].mxu0  ;;  %v2715_v33 = vpop.f32.mrb[11].mxu1  ;;  %2841 = vmatprep.subr.bf16.mxu0 %v3361_v8 }
 0x294   :  { %v1877_v16 = vadd.f32 %v2713_v26, %v550_v23  ;;  %v2737_v34 = vpop.f32.mrb[15].mxu0 }
 0x296   :  { %v1917_v37 = vadd.f32 %v2735_v31, %v1877_v16  ;;  %2842 = vmatpush3.bf16.msra.mxu0 %v3206_v30 }
 0x2b0   :  { %v1956_v38 = vpop.f32.mrb[12].mxu1 }
 0x2b1   :  { %v1957_v43 = vadd.f32 %v1956_v38, %v1917_v37  ;;  %v2825_v14 = vpop.f32.mrb[13].mxu1 }
 0x2b2   :  { %v1959_v13 = vpop.f32.mrb[14].mxu1 }
 0x2b3   :  { %v1966_v41 = vmax.f32 %v1957_v43, 0.0  ;;  %v2826_v44 = vpop.f32.mrb[15].mxu1 }
 0x2b5   :  { %v1971_v45 = vpack.c.bf16 %v1966_v41, %v1966_v41 }
 0x2b7   :  { %2844 = vmatmul.mubr.bf16.vlgmr.msra.gmra.mrb[20].mxu0 %v1971_v45 }
 0x34c   :  { %v2764_v46 = vpop.f32.mrb[16].mxu0  ;;  %v2786_v47 = vpop.f32.mrb[16].mxu1 }
 0x34d   :  { %v2765_v48 = vpop.f32.mrb[17].mxu0  ;;  %v2787_v8 = vpop.f32.mrb[17].mxu1 }
 0x34e   :  { %v2766_v49 = vadd.f32 %v2765_v48, %v2764_v46  ;;  %v2788_v50 = vadd.f32 %v2787_v8, %v2786_v47  ;;  %v2767_v51 = vpop.f32.mrb[18].mxu0  ;;  %v2789_v52 = vpop.f32.mrb[18].mxu1 }
 0x34f   :  { %v2768_v53 = vpop.f32.mrb[19].mxu0  ;;  %v2790_v54 = vpop.f32.mrb[19].mxu1 }
 0x350   :  { %v2334_v35 = vadd.f32 %v2766_v49, %v2651_v40 }
 0x352   :  { %v2374_v55 = vadd.f32 %v2788_v50, %v2334_v35 }
 0x38a   :  { %v2413_v42 = vpop.f32.mrb[20].mxu0 }
 0x38b   :  { %v2414_v56 = vadd.f32 %v2413_v42, %v2374_v55  ;;  %v2845_v57 = vpop.f32.mrb[21].mxu0 }
 0x38c   :  { %v2416_v58 = vpop.f32.mrb[22].mxu0 }
 0x38d   :  { %v2692_v27 = vmul.f32 -1.442695, %v2414_v56  ;;  %v2846_v60 = vpop.f32.mrb[23].mxu0 }
 0x38f   :  { %3207 = vpow2.f32 %v2692_v27 }
 0x399   :  { %v3208_v61 = vpop.eup %3207 }
 0x39a   :  { %v2422_v62 = vadd.f32 1.0, %v3208_v61 }
 0x39c   :  { %3209 = vrcp.f32 %v2422_v62 }
 0x3a6   :  { %v3210_v63 = vpop.eup %3209 }
 0x3a7   :  { %2425 = vst [vmem:[#allocation11] sm:$0x3] %v3210_v63 }
 0x3a8   :  { %3332 = shalt.err (!%p3329_p2)
}
 0x3a9   :  { %s3333_s21 = scalar_lea.hbm %s3584_s7, 32 }
 0x3aa   :  { %p3334_p3 = scmp.ne.s32.totalorder %s3584_s7, %s3333_s21  ;;  %p3337_p4 = scmp.lt.u32.totalorder %s3333_s21, %s3584_s7 }
 0x3ac   :  { %p3339_p5 = pnand %p3337_p4, %p3334_p3 }
 0x3ae   :  { %3342 = shalt.err (!%p3339_p5)
}
 0x3af   :  { %2435 = dma.vmem_to_hbm [thread:$0]  %s2433_s16, 32, %s3584_s7, [#allocation4]  }
 0x3b0   :  { %3349 = dma.done.wait [#allocation4], 32  }
 0x3b1   :  { %3350 = vsyncadd [#allocation4], 4294967264 }
 0x3b2   :  { %2439 = vsyncpa [#allocation3], 1 }
 0x3b3   :  { %2440 = vsyncpa [#allocation6], 1 }
 0x3b4   :  { %2441 = vsyncpa [#allocation9], 1 }
 0x3b5   :  { %2442 = vsyncpa [#allocation4], 1 }

</bundles_post_ra>
